<compile_context>
chip_gen: v6e
topology: v6e:2x2x1
jax: 0.10.0
libtpu: 0.0.40
codegen_flags: <defaults>
</compile_context>

<pallas_src>
import functools

import jax
import jax.numpy as jnp
import numpy as np
from jax.experimental import pallas as pl
from jax.experimental.pallas import tpu as pltpu


def _patchnce_kernel(q_ref, kneg_ref, kpos_ref, loss_ref,
                     pos_sc, m_sc, l_sc, *, inv_T, tq, tk, npatches):
    # q_ref:    (BB, TQ, D)  query stripe (resident across the K-chunk axis)
    # kneg_ref: (BB, TK, D)  streamed chunk of negatives
    # kpos_ref: (BB, TQ, D)  K rows matching this query stripe (positives)
    # loss_ref: (BB, TQ, 1)  per-row loss, written on the last K chunk
    qi = pl.program_id(1)
    ki = pl.program_id(2)
    nk = pl.num_programs(2)

    @pl.when(ki == 0)
    def _init():
        # Positive logit in f32 (row-wise dot with the matching K rows);
        # temperature applied after the D-reduction.
        q32 = q_ref[...].astype(jnp.float32)
        k32 = kpos_ref[...].astype(jnp.float32)
        pos = jnp.sum(q32 * k32, axis=-1, keepdims=True) * jnp.float32(inv_T)
        pos_sc[...] = pos
        m_sc[...] = pos                                   # running max seeded with pos
        l_sc[...] = jnp.ones(l_sc.shape, jnp.float32)     # exp(pos - pos)

    # Negatives chunk on the MXU. Temperature folded into Q (TQ*D multiply
    # instead of TQ*TK); operands stay in the input dtype, f32 accumulation.
    # dot_general contracts the minor dim of both operands (== trans_b matmul),
    # which the MXU supports natively — no in-kernel K transpose / relayout.
    q_mxu = q_ref[...] * jnp.asarray(inv_T, dtype=q_ref.dtype)
    s = jax.lax.dot_general(
        q_mxu, kneg_ref[...],
        dimension_numbers=(((2,), (2,)), ((0,), (0,))),
        preferred_element_type=jnp.float32)               # (BB, TQ, TK)

    # Global-diagonal mask from two 1-D iotas compared via broadcasting
    # (no (TQ, TK) int32 temporaries).
    q_start = qi * tq
    k_start = ki * tk
    row = jax.lax.broadcasted_iota(jnp.int32, (tq, 1), 0) + q_start
    col = jax.lax.broadcasted_iota(jnp.int32, (1, tk), 1) + k_start
    s = jnp.where((row == col)[None], jnp.float32(-10.0 * inv_T), s)
    if npatches % tk != 0:
        # Ragged last K chunk: neutralize padded columns.
        s = jnp.where((col >= npatches)[None], jnp.float32(-1e30), s)

    # Online logsumexp over the negatives axis (flash-style accumulation).
    m_prev = m_sc[...]
    m_new = jnp.maximum(m_prev, jnp.max(s, axis=-1, keepdims=True))
    p_sum = jnp.sum(jnp.exp(s - m_new), axis=-1, keepdims=True)
    l_sc[...] = l_sc[...] * jnp.exp(m_prev - m_new) + p_sum
    m_sc[...] = m_new

    @pl.when(ki == nk - 1)
    def _finalize():
        # Cross entropy with target index 0 over cat([pos, negatives]):
        #   loss = logsumexp(all logits) - pos
        loss = m_sc[...] + jnp.log(l_sc[...]) - pos_sc[...]
        loss_ref[...] = loss.astype(loss_ref.dtype)


def _vmem_bytes(bb, tq, tk, dim, itemsize):
    """Rough per-step VMEM footprint: pipelined buffers + stripe temporaries."""
    dbl_inputs = 2 * bb * (2 * tq + tk) * dim * itemsize   # q, kpos, kneg (x2 buffers)
    out = 2 * bb * tq * 4
    scratch = 3 * bb * tq * 4                              # pos / m / l
    stripe_tmp = 3 * bb * tq * tk * 4                      # s, exp(s-m), where temps
    return dbl_inputs + out + scratch + stripe_tmp + (2 << 20)


def _vmem_budget():
    """Generation-aware scoped-VMEM ceiling (~3/4 of physical per-core VMEM)."""
    cap = 0
    try:
        cap = int(getattr(pltpu.get_tpu_info(), "vmem_capacity_bytes", 0))
    except Exception:
        cap = 0
    if cap <= 0:
        cap = 64 << 20      # conservative default == v7x per-TensorCore VMEM
    return (cap * 3) // 4


def _choose_tiles(batch_dim, npatches, dim, itemsize, budget):
    """Return (bb, tq, tk): batches folded per step, query stripe, negatives chunk."""
    if npatches <= 512:
        # Small-P regime: a single full stripe; fold batches to amortize the
        # ~0.35us/step pipeline overhead (fold cap is generation-aware).
        tq = tk = npatches
        fold_cap = min(budget // 4, 16 << 20)
        bb = 1
        for d in range(batch_dim, 0, -1):
            if batch_dim % d == 0 and _vmem_bytes(d, tq, tk, dim, itemsize) <= fold_cap:
                bb = d
                break
        return bb, tq, tk
    # Large-P regime: MXU-friendly stripes; online softmax over K chunks bounds
    # VMEM to O(tq*tk). Ragged tails are handled by masking (never tq=8).
    tq, tk = 512, 512
    while tk > 128 and _vmem_bytes(1, tq, tk, dim, itemsize) > budget:
        tk //= 2
    while tq > 128 and _vmem_bytes(1, tq, tk, dim, itemsize) > budget:
        tq //= 2
    return 1, tq, tk


def patchnce_loss(feat_q, feat_k, *, batch_size, nce_T,
                  nce_includes_all_negatives_from_minibatch=False):
    """JAX/Pallas equivalent of PatchNCELoss.forward (reduction='none')."""
    n, dim = feat_q.shape
    batch_dim_for_bmm = (1 if nce_includes_all_negatives_from_minibatch
                         else batch_size)
    assert n % batch_dim_for_bmm == 0, (
        "batchSize must be divisible by batch_dim_for_bmm "
        f"(got {n} and {batch_dim_for_bmm})")
    npatches = n // batch_dim_for_bmm

    feat_k = jax.lax.stop_gradient(feat_k)   # .detach()
    q = feat_q.reshape(batch_dim_for_bmm, npatches, dim)
    k = feat_k.reshape(batch_dim_for_bmm, npatches, dim)

    itemsize = jnp.dtype(feat_q.dtype).itemsize
    budget = _vmem_budget()
    bb, tq, tk = _choose_tiles(batch_dim_for_bmm, npatches, dim, itemsize, budget)
    n_b = batch_dim_for_bmm // bb
    n_q = (npatches + tq - 1) // tq
    n_k = (npatches + tk - 1) // tk

    vmem_limit = int(min(budget,
                         max(_vmem_bytes(bb, tq, tk, dim, itemsize), 32 << 20)))

    kernel = functools.partial(_patchnce_kernel, inv_T=float(1.0 / nce_T),
                               tq=tq, tk=tk, npatches=npatches)

    loss = pl.pallas_call(
        kernel,
        out_shape=jax.ShapeDtypeStruct((batch_dim_for_bmm, npatches, 1),
                                       jnp.float32),
        grid_spec=pltpu.PrefetchScalarGridSpec(
            num_scalar_prefetch=0,
            grid=(n_b, n_q, n_k),
            in_specs=[
                # Q stripe: resident across the K-chunk axis.
                pl.BlockSpec((bb, tq, dim), lambda b, qt, kt: (b, qt, 0)),
                # Negatives chunk: streamed along the K-chunk axis.
                pl.BlockSpec((bb, tk, dim), lambda b, qt, kt: (b, kt, 0)),
                # K rows matching this Q stripe (positives), resident across K.
                pl.BlockSpec((bb, tq, dim), lambda b, qt, kt: (b, qt, 0)),
            ],
            out_specs=pl.BlockSpec((bb, tq, 1), lambda b, qt, kt: (b, qt, 0)),
            scratch_shapes=[pltpu.VMEM((bb, tq, 1), jnp.float32),   # pos
                            pltpu.VMEM((bb, tq, 1), jnp.float32),   # running max
                            pltpu.VMEM((bb, tq, 1), jnp.float32)],  # running sum
        ),
        compiler_params=pltpu.CompilerParams(
            # batch & query axes are independent (megacore-shardable on v7x);
            # the K-chunk axis is the online-softmax reduction -> sequential.
            dimension_semantics=("parallel", "parallel", "arbitrary"),
            vmem_limit_bytes=vmem_limit),
    )(q, k, k)

    return loss.reshape(-1)   # (batchSize,) per-row loss, like reduction='none'


def _reference(feat_q, feat_k, *, batch_size, nce_T):
    """Pure-JAX reference mirroring the PyTorch forward, for verification."""
    n, dim = feat_q.shape
    q = feat_q.reshape(batch_size, -1, dim).astype(jnp.float32)
    k = feat_k.reshape(batch_size, -1, dim).astype(jnp.float32)
    npatches = q.shape[1]
    l_pos = jnp.einsum('bpd,bpd->bp', q, k).reshape(-1, 1)
    l_neg = jnp.einsum('bpd,bqd->bpq', q, k)
    eye = jnp.eye(npatches, dtype=bool)[None]
    l_neg = jnp.where(eye, -10.0, l_neg).reshape(-1, npatches)
    out = jnp.concatenate([l_pos, l_neg], axis=1) / nce_T
    return jax.nn.logsumexp(out, axis=1) - out[:, 0]


if __name__ == "__main__":
    # opt-equivalent hyperparameters (small deterministic test)
    batch_size = 2
    nce_T = 0.07
    npatches = 8
    dim = 32
    n = batch_size * npatches     # flattened patch count = "batchSize" in torch

    key = jax.random.PRNGKey(0)
    kq, kk = jax.random.split(key)
    feat_q = jax.random.normal(kq, (n, dim), dtype=jnp.float32)
    feat_k = jax.random.normal(kk, (n, dim), dtype=jnp.float32)

    loss = patchnce_loss(feat_q, feat_k, batch_size=batch_size, nce_T=nce_T)
    loss = jax.block_until_ready(loss)

    ref = _reference(feat_q, feat_k, batch_size=batch_size, nce_T=nce_T)
    np.testing.assert_allclose(np.asarray(loss), np.asarray(ref),
                               rtol=1e-4, atol=1e-4)
    assert loss.shape == (n,)
    print("KERNEL_OK")
</pallas_src>

<mosaic_0001>
module attributes {stable_mosaic.version = 11 : i64} {
  func.func @_patchnce_kernel(%arg0: i32, %arg1: i32, %arg2: i32, %arg3: memref<2x8x32xf32, #tpu.memory_space<vmem>>, %arg4: memref<2x8x32xf32, #tpu.memory_space<vmem>>, %arg5: memref<2x8x32xf32, #tpu.memory_space<vmem>>, %arg6: memref<2x8x1xf32, #tpu.memory_space<vmem>>, %arg7: memref<2x8x1xf32, #tpu.memory_space<vmem>>, %arg8: memref<2x8x1xf32, #tpu.memory_space<vmem>>, %arg9: memref<2x8x1xf32, #tpu.memory_space<vmem>>) attributes {dimension_semantics = [#tpu.dimension_semantics<parallel>, #tpu.dimension_semantics<parallel>, #tpu.dimension_semantics<arbitrary>], iteration_bounds = array<i64: 1, 1, 1>, scalar_prefetch = 0 : i64, scratch_operands = 3 : i64, tpu.core_type = #tpu.core_type<tc>, window_params = [{transform_indices = @transform_0, window_bounds = array<i64: 2, 8, 32>}, {transform_indices = @transform_1, window_bounds = array<i64: 2, 8, 32>}, {transform_indices = @transform_2, window_bounds = array<i64: 2, 8, 32>}, {transform_indices = @transform_3, window_bounds = array<i64: 2, 8, 1>}]} {
    %c0_i32 = arith.constant 0 : i32
    %0 = arith.cmpi eq, %arg2, %c0_i32 : i32
    %1 = arith.extui %0 : i1 to i32
    %c0_i32_0 = arith.constant 0 : i32
    %2 = arith.cmpi ne, %1, %c0_i32_0 : i32
    scf.if %2 {
      %c0_25 = arith.constant 0 : index
      %c0_26 = arith.constant 0 : index
      %c0_27 = arith.constant 0 : index
      %43 = vector.load %arg3[%c0_25, %c0_26, %c0_27] : memref<2x8x32xf32, #tpu.memory_space<vmem>>, vector<2x8x32xf32>
      %c0_28 = arith.constant 0 : index
      %c0_29 = arith.constant 0 : index
      %c0_30 = arith.constant 0 : index
      %44 = vector.load %arg5[%c0_28, %c0_29, %c0_30] : memref<2x8x32xf32, #tpu.memory_space<vmem>>, vector<2x8x32xf32>
      %45 = arith.mulf %43, %44 : vector<2x8x32xf32>
      %cst_31 = arith.constant dense<0.000000e+00> : vector<2x8xf32>
      %46 = vector.multi_reduction <add>, %45, %cst_31 [2] : vector<2x8x32xf32> to vector<2x8xf32>
      %47 = vector.shape_cast %46 : vector<2x8xf32> to vector<2x8x1xf32>
      %cst_32 = arith.constant 14.2857141 : f32
      %48 = vector.broadcast %cst_32 : f32 to vector<2x8x1xf32>
      %49 = arith.mulf %47, %48 : vector<2x8x1xf32>
      %c0_33 = arith.constant 0 : index
      %c0_34 = arith.constant 0 : index
      %c0_35 = arith.constant 0 : index
      %50 = vector.load %arg7[%c0_33, %c0_34, %c0_35] : memref<2x8x1xf32, #tpu.memory_space<vmem>>, vector<2x8x1xf32>
      tpu.vector_store %arg7[%c0_33, %c0_34, %c0_35], %49 {strides = array<i32>} : memref<2x8x1xf32, #tpu.memory_space<vmem>>, vector<2x8x1xf32>,
      %c0_36 = arith.constant 0 : index
      %c0_37 = arith.constant 0 : index
      %c0_38 = arith.constant 0 : index
      %51 = vector.load %arg8[%c0_36, %c0_37, %c0_38] : memref<2x8x1xf32, #tpu.memory_space<vmem>>, vector<2x8x1xf32>
      tpu.vector_store %arg8[%c0_36, %c0_37, %c0_38], %49 {strides = array<i32>} : memref<2x8x1xf32, #tpu.memory_space<vmem>>, vector<2x8x1xf32>,
      %cst_39 = arith.constant 1.000000e+00 : f32
      %52 = vector.broadcast %cst_39 : f32 to vector<2x8x1xf32>
      %c0_40 = arith.constant 0 : index
      %c0_41 = arith.constant 0 : index
      %c0_42 = arith.constant 0 : index
      %53 = vector.load %arg9[%c0_40, %c0_41, %c0_42] : memref<2x8x1xf32, #tpu.memory_space<vmem>>, vector<2x8x1xf32>
      tpu.vector_store %arg9[%c0_40, %c0_41, %c0_42], %52 {strides = array<i32>} : memref<2x8x1xf32, #tpu.memory_space<vmem>>, vector<2x8x1xf32>,
    } else {
    }
    %c0 = arith.constant 0 : index
    %c0_1 = arith.constant 0 : index
    %c0_2 = arith.constant 0 : index
    %3 = vector.load %arg3[%c0, %c0_1, %c0_2] : memref<2x8x32xf32, #tpu.memory_space<vmem>>, vector<2x8x32xf32>
    %cst = arith.constant 14.2857141 : f32
    %4 = vector.broadcast %cst : f32 to vector<2x8x32xf32>
    %5 = arith.mulf %3, %4 : vector<2x8x32xf32>
    %c0_3 = arith.constant 0 : index
    %c0_4 = arith.constant 0 : index
    %c0_5 = arith.constant 0 : index
    %6 = vector.load %arg4[%c0_3, %c0_4, %c0_5] : memref<2x8x32xf32, #tpu.memory_space<vmem>>, vector<2x8x32xf32>
    %cst_6 = arith.constant dense<0.000000e+00> : vector<2x8x8xf32>
    %7 = tpu.matmul %5, %6, %cst_6 {dimension_numbers = #tpu.dot_dimension_numbers<[2], [2], [1], [1], [0, 0, 0, 1, 1, 1], [0], [0]>} : vector<2x8x32xf32>, vector<2x8x32xf32>, vector<2x8x8xf32> -> vector<2x8x8xf32>
    %c8_i32 = arith.constant 8 : i32
    %8 = arith.muli %arg1, %c8_i32 : i32
    %c8_i32_7 = arith.constant 8 : i32
    %9 = arith.muli %arg2, %c8_i32_7 : i32
    %10 = tpu.iota {dimensions = array<i32: 0>} : vector<8x1xi32>
    %11 = vector.broadcast %8 : i32 to vector<8x1xi32>
    %12 = arith.addi %10, %11 : vector<8x1xi32>
    %13 = tpu.iota {dimensions = array<i32: 1>} : vector<1x8xi32>
    %14 = vector.broadcast %9 : i32 to vector<1x8xi32>
    %15 = arith.addi %13, %14 : vector<1x8xi32>
    %16 = vector.broadcast %12 : vector<8x1xi32> to vector<8x8xi32>
    %17 = vector.broadcast %15 : vector<1x8xi32> to vector<8x8xi32>
    %18 = arith.cmpi eq, %16, %17 : vector<8x8xi32>
    %19 = vector.shape_cast %18 : vector<8x8xi1> to vector<1x8x8xi1>
    %cst_8 = arith.constant -142.857147 : f32
    %20 = vector.shape_cast %19 : vector<1x8x8xi1> to vector<1x8x8xi1>
    %21 = vector.broadcast %20 : vector<1x8x8xi1> to vector<2x8x8xi1>
    %22 = vector.broadcast %cst_8 : f32 to vector<2x8x8xf32>
    %23 = arith.select %21, %22, %7 : vector<2x8x8xi1>, vector<2x8x8xf32>
    %c0_9 = arith.constant 0 : index
    %c0_10 = arith.constant 0 : index
    %c0_11 = arith.constant 0 : index
    %24 = vector.load %arg8[%c0_9, %c0_10, %c0_11] : memref<2x8x1xf32, #tpu.memory_space<vmem>>, vector<2x8x1xf32>
    %cst_12 = arith.constant dense<0xFF800000> : vector<2x8xf32>
    %25 = vector.multi_reduction <maximumf>, %23, %cst_12 [2] : vector<2x8x8xf32> to vector<2x8xf32>
    %26 = vector.shape_cast %25 : vector<2x8xf32> to vector<2x8x1xf32>
    %27 = arith.maximumf %24, %26 : vector<2x8x1xf32>
    %28 = vector.broadcast %27 : vector<2x8x1xf32> to vector<2x8x8xf32>
    %29 = arith.subf %23, %28 : vector<2x8x8xf32>
    %30 = math.exp %29 : vector<2x8x8xf32>
    %cst_13 = arith.constant dense<0.000000e+00> : vector<2x8xf32>
    %31 = vector.multi_reduction <add>, %30, %cst_13 [2] : vector<2x8x8xf32> to vector<2x8xf32>
    %32 = vector.shape_cast %31 : vector<2x8xf32> to vector<2x8x1xf32>
    %c0_14 = arith.constant 0 : index
    %c0_15 = arith.constant 0 : index
    %c0_16 = arith.constant 0 : index
    %33 = vector.load %arg9[%c0_14, %c0_15, %c0_16] : memref<2x8x1xf32, #tpu.memory_space<vmem>>, vector<2x8x1xf32>
    %34 = arith.subf %24, %27 : vector<2x8x1xf32>
    %35 = math.exp %34 : vector<2x8x1xf32>
    %36 = arith.mulf %33, %35 : vector<2x8x1xf32>
    %37 = arith.addf %36, %32 : vector<2x8x1xf32>
    %c0_17 = arith.constant 0 : index
    %c0_18 = arith.constant 0 : index
    %c0_19 = arith.constant 0 : index
    %38 = vector.load %arg9[%c0_17, %c0_18, %c0_19] : memref<2x8x1xf32, #tpu.memory_space<vmem>>, vector<2x8x1xf32>
    tpu.vector_store %arg9[%c0_17, %c0_18, %c0_19], %37 {strides = array<i32>} : memref<2x8x1xf32, #tpu.memory_space<vmem>>, vector<2x8x1xf32>,
    %c0_20 = arith.constant 0 : index
    %c0_21 = arith.constant 0 : index
    %c0_22 = arith.constant 0 : index
    %39 = vector.load %arg8[%c0_20, %c0_21, %c0_22] : memref<2x8x1xf32, #tpu.memory_space<vmem>>, vector<2x8x1xf32>
    tpu.vector_store %arg8[%c0_20, %c0_21, %c0_22], %27 {strides = array<i32>} : memref<2x8x1xf32, #tpu.memory_space<vmem>>, vector<2x8x1xf32>,
    %c0_i32_23 = arith.constant 0 : i32
    %40 = arith.cmpi eq, %arg2, %c0_i32_23 : i32
    %41 = arith.extui %40 : i1 to i32
    %c0_i32_24 = arith.constant 0 : i32
    %42 = arith.cmpi ne, %41, %c0_i32_24 : i32
    scf.if %42 {
      %c0_25 = arith.constant 0 : index
      %c0_26 = arith.constant 0 : index
      %c0_27 = arith.constant 0 : index
      %43 = vector.load %arg8[%c0_25, %c0_26, %c0_27] : memref<2x8x1xf32, #tpu.memory_space<vmem>>, vector<2x8x1xf32>
      %c0_28 = arith.constant 0 : index
      %c0_29 = arith.constant 0 : index
      %c0_30 = arith.constant 0 : index
      %44 = vector.load %arg9[%c0_28, %c0_29, %c0_30] : memref<2x8x1xf32, #tpu.memory_space<vmem>>, vector<2x8x1xf32>
      %45 = math.log %44 : vector<2x8x1xf32>
      %46 = arith.addf %43, %45 : vector<2x8x1xf32>
      %c0_31 = arith.constant 0 : index
      %c0_32 = arith.constant 0 : index
      %c0_33 = arith.constant 0 : index
      %47 = vector.load %arg7[%c0_31, %c0_32, %c0_33] : memref<2x8x1xf32, #tpu.memory_space<vmem>>, vector<2x8x1xf32>
      %48 = arith.subf %46, %47 : vector<2x8x1xf32>
      %c0_34 = arith.constant 0 : index
      %c0_35 = arith.constant 0 : index
      %c0_36 = arith.constant 0 : index
      %49 = vector.load %arg6[%c0_34, %c0_35, %c0_36] : memref<2x8x1xf32, #tpu.memory_space<vmem>>, vector<2x8x1xf32>
      tpu.vector_store %arg6[%c0_34, %c0_35, %c0_36], %48 {strides = array<i32>} : memref<2x8x1xf32, #tpu.memory_space<vmem>>, vector<2x8x1xf32>,
    } else {
    }
    return
  }
  func.func @transform_0(%arg0: i32, %arg1: i32, %arg2: i32) -> (i32, i32, i32) {
    %c0_i32 = arith.constant 0 : i32
    %c0_i32_0 = arith.constant 0 : i32
    return %arg0, %arg1, %c0_i32 : i32, i32, i32
  }
  func.func @transform_1(%arg0: i32, %arg1: i32, %arg2: i32) -> (i32, i32, i32) {
    %c0_i32 = arith.constant 0 : i32
    %c0_i32_0 = arith.constant 0 : i32
    return %arg0, %arg2, %c0_i32 : i32, i32, i32
  }
  func.func @transform_2(%arg0: i32, %arg1: i32, %arg2: i32) -> (i32, i32, i32) {
    %c0_i32 = arith.constant 0 : i32
    %c0_i32_0 = arith.constant 0 : i32
    return %arg0, %arg1, %c0_i32 : i32, i32, i32
  }
  func.func @transform_3(%arg0: i32, %arg1: i32, %arg2: i32) -> (i32, i32, i32) {
    %c0_i32 = arith.constant 0 : i32
    %c0_i32_0 = arith.constant 0 : i32
    return %arg0, %arg1, %c0_i32 : i32, i32, i32
  }
}

</mosaic_0001>

<bundles_post_ra>
// kernel: tpu_custom_call.1
= control target key start
LH: loop header
LB: loop body
LE: loop exit
PB: predicated region body
PF: predicated region fallthrough
CT: control target
= control target key end

     0   :  { %8 = vsyncpa [#allocation6], 0  ;;  %s501_s0 = inlined_call_operand.hbm [shape: f32[2,8,32], index: 0, kind: input, shape index: {}]   ;;  %s502_s1 = inlined_call_operand.hbm [shape: f32[2,8,32], index: 1, kind: input, shape index: {}]   ;;  %s503_s2 = inlined_call_operand.hbm [shape: f32[2,8,32], index: 2, kind: input, shape index: {}]   ;;  %s504_s3 = inlined_call_operand.vmem [shape: f32[2,8,1], index: 3, kind: output, shape index: {}]  }
   0x1   :  { %9 = vsyncpa [#allocation8], 0  ;;  %s435_s12 = smov [#allocation7]   ;;  %s436_s14 = smov [#allocation5]  }
   0x2   :  { %s27_s13 = sshll.u32 %s435_s12, 4  ;;  %s15_s15 = sshll.u32 %s436_s14, 4  ;;  %s28_s13 = int_to_ptr.vmem [resolvable:$true] %s27_s13  ;;  %s16_s15 = int_to_ptr.vmem [resolvable:$true] %s15_s15 }
   0x3   :  { %s379_s16 = scalar_lea.vmem %s28_s13, 256  ;;  %p384_p1 = scmp.lt.s32.totalorder %s28_s13, %s28_s13 }
   0x4   :  { %p380_p0 = scmp.ne.s32.totalorder %s28_s13, %s379_s16  ;;  %p385_p2 = scmp.lt.s32.totalorder %s379_s16, %s379_s16 }
   0x6   :  { %p386_p3 = por %p385_p2, %p384_p1 }
   0x8   :  { %p387_p4 = pnand %p386_p3, %p380_p0 }
   0xa   :  { %390 = shalt.err (!%p387_p4)
}
   0xb   :  { %s437_s17 = smov 128   ;;  %s438_s18 = smov 8  }
   0xc   :  { %33 = dma.hbm_to_vmem [thread:$0]  %s502_s1, 256, %s28_s13, [#allocation8], %s437_s17, %s437_s17, %s438_s18  }
   0xd   :  { %s399_s21 = scalar_lea.vmem %s16_s15, 256  ;;  %p404_p6 = scmp.lt.s32.totalorder %s16_s15, %s16_s15 }
   0xe   :  { %p400_p5 = scmp.ne.s32.totalorder %s16_s15, %s399_s21  ;;  %p405_p7 = scmp.lt.s32.totalorder %s399_s21, %s399_s21 }
  0x10   :  { %p406_p8 = por %p405_p7, %p404_p6 }
  0x12   :  { %p407_p9 = pnand %p406_p8, %p400_p5 }
  0x14   :  { %410 = shalt.err (!%p407_p9)
}
  0x15   :  { %21 = dma.hbm_to_vmem [thread:$0]  %s501_s0, 256, %s16_s15, [#allocation6], %s437_s17, %s437_s17, %s438_s18  }
  0x16   :  { %s439_s24 = smov [#allocation9]  }
  0x17   :  { %s39_s25 = sshll.u32 %s439_s24, 4  ;;  %s40_s25 = int_to_ptr.vmem [resolvable:$true] %s39_s25 }
  0x18   :  { %s419_s26 = scalar_lea.vmem %s40_s25, 256  ;;  %p424_p11 = scmp.lt.s32.totalorder %s40_s25, %s40_s25 }
  0x19   :  { %p420_p10 = scmp.ne.s32.totalorder %s40_s25, %s419_s26  ;;  %p425_p12 = scmp.lt.s32.totalorder %s419_s26, %s419_s26 }
  0x1b   :  { %p426_p13 = por %p425_p12, %p424_p11 }
  0x1d   :  { %p427_p0 = pnand %p426_p13, %p420_p10 }
  0x1f   :  { %430 = shalt.err (!%p427_p0)
}
  0x20   :  { %45 = dma.hbm_to_vmem [thread:$0]  %s503_s2, 256, %s40_s25, [#allocation8], %s437_s17, %s437_s17, %s438_s18  }
  0x21   :  { %431 = dma.done.wait [#allocation6], 256  }
  0x22   :  { %432 = vsyncadd [#allocation6], 4294967040 }
  0x23   :  { %433 = dma.done.wait [#allocation8], 512  }
  0x24   :  { %434 = vsyncadd [#allocation8], 4294966784  ;;  %v440_v0 = vmov 0.0   ;;  %vm441_vm0 = vmmov 0   ;;  %vm65_vm1 = vcmask 261120   ;;  %v85_v1 = vld [vmem:[#allocation7] sm:$0xff]  ;;  %v242_v17 = vlaneseq }
  0x25   :  { %338 = vmatprep.subr.mxu0 %v440_v0  ;;  %343 = vmatprep.subr.mxu1 %v440_v0  ;;  %v86_v2 = vld [vmem:[#allocation7 + $0x8] sm:$0xff]  ;;  %v81_v3 = vld [vmem:[#allocation5] sm:$0xff]  ;;  %v82_v5 = vld [vmem:[#allocation5 + $0x8] sm:$0xff]  ;;  %vm74_vm2 = vcmask 7168   ;;  %vm257_vm4 = vcmask 64512   ;;  %v442_v28 = vmov 0  }
  0x26   :  { %340 = vmatprep.mubr.msk.f32.mxu0 %vm441_vm0, %v440_v0  ;;  %345 = vmatprep.mubr.msk.f32.mxu1 %vm441_vm0, %v440_v0  ;;  %v83_v4 = vmul.f32 14.285714, %v81_v3  ;;  %v61_v6 = vld [vmem:[#allocation9] sm:$0xff]  ;;  %v62_v7 = vld [vmem:[#allocation9 + $0x8] sm:$0xff]  ;;  %v84_v8 = vmul.f32 14.285714, %v82_v5 }
  0x27   :  { %339 = vmatpush3.xpose.msk.msra.mxu0 %vm65_vm1, %v85_v1  ;;  %344 = vmatpush3.xpose.msk.msra.mxu1 %vm65_vm1, %v86_v2  ;;  %v63_v9 = vmul.f32 %v81_v3, %v61_v6  ;;  %v64_v10 = vmul.f32 %v82_v5, %v62_v7  ;;  %v243_v18 = vshrl.u32 %v242_v17, 7  ;;  %v247_v19 = vand.u32 127, %v242_v17 }
  0x28   :  { %357 = vset.pattern.permute.xlu0 %v442_v28  ;;  %358 = vset.pattern.permute.xlu1 %v442_v28  ;;  %v443_v29 = vmov 1.0  }
  0x29   :  { %v66_v11 = vsel %vm65_vm1, %v63_v9, 0.0  ;;  %v69_v12 = vsel %vm65_vm1, %v64_v10, 0.0  ;;  %vm250_vm3 = vcmp.eq.s32.totalorder %v243_v18, %v247_v19  ;;  %79 = vst.msk [vmem:[#allocation4] sm:$0xff] %vm74_vm2, %v443_v29  ;;  %80 = vst.msk [vmem:[#allocation4 + $0x8] sm:$0xff] %vm74_vm2, %v443_v29 }
  0x2a   :  { %341 = vmatmul.mubr.msk.f32.vlgmr.msra.gmra.mxu0 %vm65_vm1, %v83_v4  ;;  %346 = vmatmul.mubr.msk.f32.vlgmr.msra.gmra.mxu1 %vm65_vm1, %v84_v8 }
  0x2b   :  { %67 = vadd.xlane.f32.xlu0 %v66_v11 }
  0x2f   :  { %70 = vadd.xlane.f32.xlu0 %v69_v12 }
  0x30   :  { %v288_v51 = vld [vmem:[#allocation4] sm:$0xff]  ;;  %v289_v55 = vld [vmem:[#allocation4 + $0x8] sm:$0xff] }
  0xb4   :  { %v68_v13 = vpop.xlane.xlu0 %67 }
  0xb5   :  { %v72_v14 = vmul.f32 14.285714, %v68_v13 }
  0xb7   :  { %75 = vst.msk [vmem:[#allocation2] sm:$0xff] %vm74_vm2, %v72_v14  ;;  %77 = vst.msk [vmem:[#allocation3] sm:$0xff] %vm74_vm2, %v72_v14 }
  0xb8   :  { %v71_v15 = vpop.xlane.xlu0 %70 }
  0xb9   :  { %v73_v16 = vmul.f32 14.285714, %v71_v15 }
  0xbb   :  { %76 = vst.msk [vmem:[#allocation2 + $0x8] sm:$0xff] %vm74_vm2, %v73_v16  ;;  %78 = vst.msk [vmem:[#allocation3 + $0x8] sm:$0xff] %vm74_vm2, %v73_v16 }
  0xbe   :  { %v255_v30 = vld [vmem:[#allocation3] sm:$0xff]  ;;  %v318_v3 = vld [vmem:[#allocation2] sm:$0xff] }
  0xc2   :  { %v256_v33 = vld [vmem:[#allocation3 + $0x8] sm:$0xff]  ;;  %v319_v8 = vld [vmem:[#allocation2 + $0x8] sm:$0xff] }
  0xea   :  { %v160_v20 = vpop.f32.mrf.mxu0  ;;  %v236_v21 = vpop.f32.mrf.mxu1 }
  0xeb   :  { %v253_v22 = vsel %vm250_vm3, -142.85715, %v160_v20  ;;  %v254_v23 = vsel %vm250_vm3, -142.85715, %v236_v21 }
  0xec   :  { %v342_v24 = vpop.f32.mrf.mxu0  ;;  %v258_v25 = vsel %vm257_vm4, %v253_v22, -inf  ;;  %v347_v26 = vpop.f32.mrf.mxu1  ;;  %v261_v27 = vsel %vm257_vm4, %v254_v23, -inf }
  0xed   :  { %259 = vmax.xlane.f32.xlu1 %v258_v25 }
  0xf1   :  { %262 = vmax.xlane.f32.xlu1 %v261_v27 }
 0x176   :  { %v260_v31 = vpop.xlane.xlu1 %259 }
 0x177   :  { %v264_v32 = vmax.f32 %v255_v30, %v260_v31 }
 0x179   :  { %v290_v34 = vsub.f32 %v255_v30, %v264_v32  ;;  %303 = vst.msk [vmem:[#allocation3] sm:$0xff] %vm74_vm2, %v264_v32  ;;  %268 = vperm.xlu0 %357, %v264_v32  }
 0x17a   :  { %v263_v35 = vpop.xlane.xlu1 %262 }
 0x17b   :  { %v265_v36 = vmax.f32 %v256_v33, %v263_v35  ;;  %v292_v48 = vmul.f32 1.442695, %v290_v34 }
 0x17d   :  { %v291_v37 = vsub.f32 %v256_v33, %v265_v36  ;;  %304 = vst.msk [vmem:[#allocation3 + $0x8] sm:$0xff] %vm74_vm2, %v265_v36  ;;  %273 = vperm.xlu1 %358, %v265_v36  }
 0x17f   :  { %v294_v49 = vmul.f32 1.442695, %v291_v37 }
 0x180   :  { %v308_v0 = vld [vmem:[#allocation3] sm:$0xff] }
 0x184   :  { %v309_v6 = vld [vmem:[#allocation3 + $0x8] sm:$0xff] }
 0x1f4   :  { %v269_v38 = vpop.permute.xlu0 %268 }
 0x1f5   :  { %v276_v39 = vsub.f32 %v253_v22, %v269_v38 }
 0x1f7   :  { %v278_v40 = vmul.f32 1.442695, %v276_v39 }
 0x1f8   :  { %v274_v41 = vpop.permute.xlu1 %273 }
 0x1f9   :  { %359 = vpow2.f32 %v278_v40  ;;  %v277_v42 = vsub.f32 %v254_v23, %v274_v41 }
 0x1fb   :  { %v280_v43 = vmul.f32 1.442695, %v277_v42 }
 0x1fd   :  { %361 = vpow2.f32 %v280_v43 }
 0x1fe   :  { %363 = vpow2.f32 %v292_v48 }
 0x1ff   :  { %365 = vpow2.f32 %v294_v49 }
 0x206   :  { %v360_v44 = vpop.eup %359 }
 0x207   :  { %v282_v45 = vsel %vm257_vm4, %v360_v44, 0.0 }
 0x208   :  { %283 = vadd.xlane.f32.xlu1 %v282_v45 }
 0x20a   :  { %v362_v46 = vpop.eup %361 }
 0x20b   :  { %v285_v47 = vsel %vm257_vm4, %v362_v46, 0.0  ;;  %v364_v50 = vpop.eup %363 }
 0x20c   :  { %286 = vadd.xlane.f32.xlu0 %v285_v47  ;;  %v296_v52 = vmul.f32 %v364_v50, %v288_v51  ;;  %v366_v53 = vpop.eup %365 }
 0x20d   :  { %v297_v57 = vmul.f32 %v366_v53, %v289_v55 }
 0x291   :  { %v284_v54 = vpop.xlane.xlu1 %283 }
 0x292   :  { %v298_v56 = vadd.f32 %v296_v52, %v284_v54 }
 0x294   :  { %301 = vst.msk [vmem:[#allocation4] sm:$0xff] %vm74_vm2, %v298_v56 }
 0x295   :  { %v287_v58 = vpop.xlane.xlu0 %286 }
 0x296   :  { %v299_v59 = vadd.f32 %v297_v57, %v287_v58 }
 0x298   :  { %302 = vst.msk [vmem:[#allocation4 + $0x8] sm:$0xff] %vm74_vm2, %v299_v59 }
 0x29b   :  { %v310_v60 = vld [vmem:[#allocation4] sm:$0xff] }
 0x29c   :  { %367 = vlog2.f32 %v310_v60 }
 0x29f   :  { %v311_v61 = vld [vmem:[#allocation4 + $0x8] sm:$0xff] }
 0x2a0   :  { %369 = vlog2.f32 %v311_v61 }
 0x2a9   :  { %v368_v62 = vpop.eup %367 }
 0x2aa   :  { %v313_v63 = vmul.f32 0.6931472, %v368_v62 }
 0x2ac   :  { %v316_v1 = vadd.f32 %v313_v63, %v308_v0 }
 0x2ad   :  { %v370_v2 = vpop.eup %369 }
 0x2ae   :  { %v320_v4 = vsub.f32 %v316_v1, %v318_v3  ;;  %v315_v5 = vmul.f32 0.6931472, %v370_v2 }
 0x2b0   :  { %322 = vst.msk [vmem:[%s504_s3] sm:$0xff] %vm74_vm2, %v320_v4  ;;  %v317_v7 = vadd.f32 %v315_v5, %v309_v6 }
 0x2b2   :  { %v321_v9 = vsub.f32 %v317_v7, %v319_v8 }
 0x2b4   :  { %323 = vst.msk [vmem:[%s504_s3 + $0x8] sm:$0xff] %vm74_vm2, %v321_v9 }
 0x2b5   :  { %328 = vsyncpa [#allocation6], 1 }
 0x2b6   :  { %329 = vsyncpa [#allocation8], 1 }

</bundles_post_ra>
